<compile_context>
chip_gen: v6e
topology: v6e:2x2x1
jax: 0.10.0
libtpu: 0.0.40
codegen_flags: <defaults>
</compile_context>

<pallas_src>
import functools
import math

import numpy as np

import jax
import jax.numpy as jnp
from jax.experimental import pallas as pl
from jax.experimental.pallas import tpu as pltpu


def _ssim_kernel(scal_ref, x_ref, y_ref, w_ref, out_ref, *,
                 win_size, k1, k2, hp):
    L = x_ref.shape[1]                       # lanes = frames_per_step * W
    half = (win_size - 1) // 2
    eps = jnp.float32(1e-6)

    # scalar reciprocals (hoisted; one scalar divide per chunk, then vmuls)
    inv_x = jnp.float32(1.0) / (scal_ref[0] + eps)
    inv_y = jnp.float32(1.0) / (scal_ref[1] + eps)

    x = x_ref[...] * inv_x + eps             # (H, L) f32
    y = y_ref[...] * inv_y + eps

    def box7(z):
        # vertical 7-tap sum via static sublane-shifted slices -> (hp, L)
        s = z[0:hp, :]
        for d in range(1, win_size):
            s = s + z[d:d + hp, :]
        # horizontal 7-tap sum via symmetric lane rolls (centred window);
        # valid results sit at frame-local columns [half, W-1-half], which is
        # exactly what the per-column weight vector selects.
        r = s
        for d in range(1, half + 1):
            r = r + pltpu.roll(s, d, axis=1) + pltpu.roll(s, L - d, axis=1)
        return r

    np_f = jnp.float32(win_size * win_size)
    inv_np = jnp.float32(1.0) / np_f
    cov_norm = np_f / (np_f - jnp.float32(1.0))

    ux = box7(x) * inv_np
    uy = box7(y) * inv_np
    uxx = box7(x * x) * inv_np
    uyy = box7(y * y) * inv_np
    uxy = box7(x * y) * inv_np

    vx = cov_norm * (uxx - ux * ux)
    vy = cov_norm * (uyy - uy * uy)
    vxy = cov_norm * (uxy - ux * uy)

    c1 = jnp.float32(k1 * k1)
    c2 = jnp.float32(k2 * k2)
    a1 = 2.0 * ux * uy + c1
    a2 = 2.0 * vxy + c2
    b1 = ux * ux + uy * uy + c1
    b2 = vx + vy + c2
    s_map = (a1 * a2) / (b1 * b2)            # exact divide (keeps rtol margin)

    # masked sum over valid window positions of real (non-padded) frames
    part = jnp.sum(s_map * w_ref[...])
    out_ref[...] = jnp.full((1, 1, 128), part, dtype=jnp.float32)


def ssim_loss(Xt, Yt, win_size=7, k1=0.01, k2=0.03):
    assert win_size % 2 == 1, "odd win_size only"
    Xt = Xt.astype(jnp.float32)
    Yt = Yt.astype(jnp.float32)
    B, T, H, W = Xt.shape
    assert H >= win_size and W >= win_size
    Hp = H - win_size + 1
    Wp = W - win_size + 1
    half = (win_size - 1) // 2
    N = B * T

    # ---- frames per grid step: keep one (H, F*W) f32 temp <= ~1 MiB --------
    max_elems = (1 << 20) // 4
    f_cap = max(1, max_elems // (H * W))
    if N <= f_cap:
        n_chunks = 1
        block_w = ((N * W + 127) // 128) * 128       # lane-dense, 128-aligned
    else:
        m = 128 // math.gcd(W, 128)                  # min F with F*W % 128 == 0
        F = max(m, (f_cap // m) * m)
        n_chunks = -(-N // F)
        block_w = F * W
    total_w = n_chunks * block_w

    # ---- pack frames along the lane axis: (B,T,H,W) -> (H, total_w) --------
    Xf = jnp.transpose(Xt.reshape(N, H, W), (1, 0, 2)).reshape(H, N * W)
    Yf = jnp.transpose(Yt.reshape(N, H, W), (1, 0, 2)).reshape(H, N * W)
    if total_w > N * W:
        pad = ((0, 0), (0, total_w - N * W))
        Xf = jnp.pad(Xf, pad)
        Yf = jnp.pad(Yf, pad)

    # per-column weight: 1.0 on valid (centred) window columns of real frames,
    # 0.0 on frame borders and zero-padded columns/frames.
    col = np.arange(total_w)
    wmask = (((col // W) < N)
             & ((col % W) >= half)
             & ((col % W) <= W - 1 - half)).astype(np.float32)
    wvec = jnp.asarray(wmask).reshape(1, total_w)

    # global maxima for the torch-style normalisation (SMEM scalars)
    scal = jnp.stack([jnp.max(Xt), jnp.max(Yt)]).astype(jnp.float32)

    kernel = functools.partial(_ssim_kernel, win_size=win_size,
                               k1=k1, k2=k2, hp=Hp)

    partials = pl.pallas_call(
        kernel,
        out_shape=jax.ShapeDtypeStruct((n_chunks, 1, 128), jnp.float32),
        grid=(n_chunks,),
        in_specs=[
            pl.BlockSpec(memory_space=pltpu.MemorySpace.SMEM),       # scal (2,)
            pl.BlockSpec((H, block_w), lambda i: (0, i)),            # X frames
            pl.BlockSpec((H, block_w), lambda i: (0, i)),            # Y frames
            pl.BlockSpec((1, block_w), lambda i: (0, i)),            # col weights
        ],
        out_specs=pl.BlockSpec((1, 1, 128), lambda i: (i, 0, 0)),
        compiler_params=pltpu.CompilerParams(
            dimension_semantics=("parallel",)),
    )(scal, Xf, Yf, wvec)

    denom = jnp.float32(N * Hp * Wp)
    return 1.0 - jnp.sum(partials[:, 0, 0]) / denom


def ssim_loss_ref(Xt, Yt, win_size=7, k1=0.01, k2=0.03):
    """Pure-JAX reference replicating the PyTorch forward (default args)."""
    Xt = Xt.astype(jnp.float32)
    Yt = Yt.astype(jnp.float32)
    Xt = Xt / (jnp.max(Xt) + 1e-6) + 1e-6
    Yt = Yt / (jnp.max(Yt) + 1e-6) + 1e-6
    B, T, H, W = Xt.shape
    NP = win_size ** 2
    cov_norm = NP / (NP - 1)
    w = jnp.ones((1, 1, win_size, win_size), jnp.float32) / NP

    def conv(z):
        return jax.lax.conv_general_dilated(
            z, w, (1, 1), 'VALID',
            dimension_numbers=('NCHW', 'OIHW', 'NCHW'))

    total = 0.0
    for t in range(T):
        X = Xt[:, t][:, None]
        Y = Yt[:, t][:, None]
        ux, uy = conv(X), conv(Y)
        uxx, uyy, uxy = conv(X * X), conv(Y * Y), conv(X * Y)
        vx = cov_norm * (uxx - ux * ux)
        vy = cov_norm * (uyy - uy * uy)
        vxy = cov_norm * (uxy - ux * uy)
        C1, C2 = k1 ** 2, k2 ** 2
        A1 = 2 * ux * uy + C1
        A2 = 2 * vxy + C2
        B1 = ux ** 2 + uy ** 2 + C1
        B2 = vx + vy + C2
        S = A1 * A2 / (B1 * B2)
        total += 1 - jnp.mean(S)
    return total / T


if __name__ == "__main__":
    key = jax.random.PRNGKey(0)
    kx, ky = jax.random.split(key)
    B, T, H, W = 2, 3, 16, 16
    Xt = jax.random.uniform(kx, (B, T, H, W), dtype=jnp.float32)
    Yt = jax.random.uniform(ky, (B, T, H, W), dtype=jnp.float32)

    loss = jax.jit(ssim_loss)(Xt, Yt)
    loss = jax.block_until_ready(loss)

    ref = ssim_loss_ref(Xt, Yt)
    assert jnp.allclose(loss, ref, rtol=1e-4, atol=1e-5), (loss, ref)
    print("KERNEL_OK")
</pallas_src>

<mosaic_0001>
module attributes {stable_mosaic.version = 11 : i64} {
  func.func @_ssim_kernel(%arg0: i32, %arg1: memref<2xf32, #tpu.memory_space<smem>>, %arg2: memref<16x128xf32, #tpu.memory_space<vmem>>, %arg3: memref<16x128xf32, #tpu.memory_space<vmem>>, %arg4: memref<1x128xf32, #tpu.memory_space<vmem>>, %arg5: memref<1x1x128xf32, #tpu.memory_space<vmem>>) attributes {dimension_semantics = [#tpu.dimension_semantics<parallel>], iteration_bounds = array<i64: 1>, scalar_prefetch = 0 : i64, scratch_operands = 0 : i64, tpu.core_type = #tpu.core_type<tc>, window_params = [{transform_indices = @transform_0, window_bounds = array<i64: 2>}, {transform_indices = @transform_1, window_bounds = array<i64: 16, 128>}, {transform_indices = @transform_2, window_bounds = array<i64: 16, 128>}, {transform_indices = @transform_3, window_bounds = array<i64: 1, 128>}, {transform_indices = @transform_4, window_bounds = array<i64: 1, 1, 128>}]} {
    %c0 = arith.constant 0 : index
    %0 = memref.load %arg1[%c0] : memref<2xf32, #tpu.memory_space<smem>>
    %cst = arith.constant 9.99999997E-7 : f32
    %1 = arith.addf %0, %cst : f32
    %cst_0 = arith.constant 1.000000e+00 : f32
    %2 = arith.divf %cst_0, %1 : f32
    %c1 = arith.constant 1 : index
    %3 = memref.load %arg1[%c1] : memref<2xf32, #tpu.memory_space<smem>>
    %cst_1 = arith.constant 9.99999997E-7 : f32
    %4 = arith.addf %3, %cst_1 : f32
    %cst_2 = arith.constant 1.000000e+00 : f32
    %5 = arith.divf %cst_2, %4 : f32
    %c0_3 = arith.constant 0 : index
    %c0_4 = arith.constant 0 : index
    %6 = vector.load %arg2[%c0_3, %c0_4] : memref<16x128xf32, #tpu.memory_space<vmem>>, vector<16x128xf32>
    %7 = vector.broadcast %2 : f32 to vector<16x128xf32>
    %8 = arith.mulf %6, %7 : vector<16x128xf32>
    %cst_5 = arith.constant 9.99999997E-7 : f32
    %9 = vector.broadcast %cst_5 : f32 to vector<16x128xf32>
    %10 = arith.addf %8, %9 : vector<16x128xf32>
    %c0_6 = arith.constant 0 : index
    %c0_7 = arith.constant 0 : index
    %11 = vector.load %arg3[%c0_6, %c0_7] : memref<16x128xf32, #tpu.memory_space<vmem>>, vector<16x128xf32>
    %12 = vector.broadcast %5 : f32 to vector<16x128xf32>
    %13 = arith.mulf %11, %12 : vector<16x128xf32>
    %cst_8 = arith.constant 9.99999997E-7 : f32
    %14 = vector.broadcast %cst_8 : f32 to vector<16x128xf32>
    %15 = arith.addf %13, %14 : vector<16x128xf32>
    %cst_9 = arith.constant 1.000000e+00 : f32
    %cst_10 = arith.constant 4.900000e+01 : f32
    %16 = arith.divf %cst_9, %cst_10 : f32
    %cst_11 = arith.constant 4.900000e+01 : f32
    %cst_12 = arith.constant 1.000000e+00 : f32
    %17 = arith.subf %cst_11, %cst_12 : f32
    %cst_13 = arith.constant 4.900000e+01 : f32
    %18 = arith.divf %cst_13, %17 : f32
    %19 = vector.extract_strided_slice %10 {offsets = [0, 0], sizes = [10, 128], strides = [1, 1]} : vector<16x128xf32> to vector<10x128xf32>
    %20 = vector.extract_strided_slice %10 {offsets = [1, 0], sizes = [10, 128], strides = [1, 1]} : vector<16x128xf32> to vector<10x128xf32>
    %21 = arith.addf %19, %20 : vector<10x128xf32>
    %22 = vector.extract_strided_slice %10 {offsets = [2, 0], sizes = [10, 128], strides = [1, 1]} : vector<16x128xf32> to vector<10x128xf32>
    %23 = arith.addf %21, %22 : vector<10x128xf32>
    %24 = vector.extract_strided_slice %10 {offsets = [3, 0], sizes = [10, 128], strides = [1, 1]} : vector<16x128xf32> to vector<10x128xf32>
    %25 = arith.addf %23, %24 : vector<10x128xf32>
    %26 = vector.extract_strided_slice %10 {offsets = [4, 0], sizes = [10, 128], strides = [1, 1]} : vector<16x128xf32> to vector<10x128xf32>
    %27 = arith.addf %25, %26 : vector<10x128xf32>
    %28 = vector.extract_strided_slice %10 {offsets = [5, 0], sizes = [10, 128], strides = [1, 1]} : vector<16x128xf32> to vector<10x128xf32>
    %29 = arith.addf %27, %28 : vector<10x128xf32>
    %30 = vector.extract_strided_slice %10 {offsets = [6, 0], sizes = [10, 128], strides = [1, 1]} : vector<16x128xf32> to vector<10x128xf32>
    %31 = arith.addf %29, %30 : vector<10x128xf32>
    %c1_i32 = arith.constant 1 : i32
    %32 = tpu.dynamic_rotate %31 by %c1_i32 dim 1 : vector<10x128xf32>, i32 -> vector<10x128xf32>
    %33 = arith.addf %31, %32 : vector<10x128xf32>
    %c127_i32 = arith.constant 127 : i32
    %34 = tpu.dynamic_rotate %31 by %c127_i32 dim 1 : vector<10x128xf32>, i32 -> vector<10x128xf32>
    %35 = arith.addf %33, %34 : vector<10x128xf32>
    %c2_i32 = arith.constant 2 : i32
    %36 = tpu.dynamic_rotate %31 by %c2_i32 dim 1 : vector<10x128xf32>, i32 -> vector<10x128xf32>
    %37 = arith.addf %35, %36 : vector<10x128xf32>
    %c126_i32 = arith.constant 126 : i32
    %38 = tpu.dynamic_rotate %31 by %c126_i32 dim 1 : vector<10x128xf32>, i32 -> vector<10x128xf32>
    %39 = arith.addf %37, %38 : vector<10x128xf32>
    %c3_i32 = arith.constant 3 : i32
    %40 = tpu.dynamic_rotate %31 by %c3_i32 dim 1 : vector<10x128xf32>, i32 -> vector<10x128xf32>
    %41 = arith.addf %39, %40 : vector<10x128xf32>
    %c125_i32 = arith.constant 125 : i32
    %42 = tpu.dynamic_rotate %31 by %c125_i32 dim 1 : vector<10x128xf32>, i32 -> vector<10x128xf32>
    %43 = arith.addf %41, %42 : vector<10x128xf32>
    %44 = vector.broadcast %16 : f32 to vector<10x128xf32>
    %45 = arith.mulf %43, %44 : vector<10x128xf32>
    %46 = vector.extract_strided_slice %15 {offsets = [0, 0], sizes = [10, 128], strides = [1, 1]} : vector<16x128xf32> to vector<10x128xf32>
    %47 = vector.extract_strided_slice %15 {offsets = [1, 0], sizes = [10, 128], strides = [1, 1]} : vector<16x128xf32> to vector<10x128xf32>
    %48 = arith.addf %46, %47 : vector<10x128xf32>
    %49 = vector.extract_strided_slice %15 {offsets = [2, 0], sizes = [10, 128], strides = [1, 1]} : vector<16x128xf32> to vector<10x128xf32>
    %50 = arith.addf %48, %49 : vector<10x128xf32>
    %51 = vector.extract_strided_slice %15 {offsets = [3, 0], sizes = [10, 128], strides = [1, 1]} : vector<16x128xf32> to vector<10x128xf32>
    %52 = arith.addf %50, %51 : vector<10x128xf32>
    %53 = vector.extract_strided_slice %15 {offsets = [4, 0], sizes = [10, 128], strides = [1, 1]} : vector<16x128xf32> to vector<10x128xf32>
    %54 = arith.addf %52, %53 : vector<10x128xf32>
    %55 = vector.extract_strided_slice %15 {offsets = [5, 0], sizes = [10, 128], strides = [1, 1]} : vector<16x128xf32> to vector<10x128xf32>
    %56 = arith.addf %54, %55 : vector<10x128xf32>
    %57 = vector.extract_strided_slice %15 {offsets = [6, 0], sizes = [10, 128], strides = [1, 1]} : vector<16x128xf32> to vector<10x128xf32>
    %58 = arith.addf %56, %57 : vector<10x128xf32>
    %c1_i32_14 = arith.constant 1 : i32
    %59 = tpu.dynamic_rotate %58 by %c1_i32_14 dim 1 : vector<10x128xf32>, i32 -> vector<10x128xf32>
    %60 = arith.addf %58, %59 : vector<10x128xf32>
    %c127_i32_15 = arith.constant 127 : i32
    %61 = tpu.dynamic_rotate %58 by %c127_i32_15 dim 1 : vector<10x128xf32>, i32 -> vector<10x128xf32>
    %62 = arith.addf %60, %61 : vector<10x128xf32>
    %c2_i32_16 = arith.constant 2 : i32
    %63 = tpu.dynamic_rotate %58 by %c2_i32_16 dim 1 : vector<10x128xf32>, i32 -> vector<10x128xf32>
    %64 = arith.addf %62, %63 : vector<10x128xf32>
    %c126_i32_17 = arith.constant 126 : i32
    %65 = tpu.dynamic_rotate %58 by %c126_i32_17 dim 1 : vector<10x128xf32>, i32 -> vector<10x128xf32>
    %66 = arith.addf %64, %65 : vector<10x128xf32>
    %c3_i32_18 = arith.constant 3 : i32
    %67 = tpu.dynamic_rotate %58 by %c3_i32_18 dim 1 : vector<10x128xf32>, i32 -> vector<10x128xf32>
    %68 = arith.addf %66, %67 : vector<10x128xf32>
    %c125_i32_19 = arith.constant 125 : i32
    %69 = tpu.dynamic_rotate %58 by %c125_i32_19 dim 1 : vector<10x128xf32>, i32 -> vector<10x128xf32>
    %70 = arith.addf %68, %69 : vector<10x128xf32>
    %71 = vector.broadcast %16 : f32 to vector<10x128xf32>
    %72 = arith.mulf %70, %71 : vector<10x128xf32>
    %73 = arith.mulf %10, %10 : vector<16x128xf32>
    %74 = vector.extract_strided_slice %73 {offsets = [0, 0], sizes = [10, 128], strides = [1, 1]} : vector<16x128xf32> to vector<10x128xf32>
    %75 = vector.extract_strided_slice %73 {offsets = [1, 0], sizes = [10, 128], strides = [1, 1]} : vector<16x128xf32> to vector<10x128xf32>
    %76 = arith.addf %74, %75 : vector<10x128xf32>
    %77 = vector.extract_strided_slice %73 {offsets = [2, 0], sizes = [10, 128], strides = [1, 1]} : vector<16x128xf32> to vector<10x128xf32>
    %78 = arith.addf %76, %77 : vector<10x128xf32>
    %79 = vector.extract_strided_slice %73 {offsets = [3, 0], sizes = [10, 128], strides = [1, 1]} : vector<16x128xf32> to vector<10x128xf32>
    %80 = arith.addf %78, %79 : vector<10x128xf32>
    %81 = vector.extract_strided_slice %73 {offsets = [4, 0], sizes = [10, 128], strides = [1, 1]} : vector<16x128xf32> to vector<10x128xf32>
    %82 = arith.addf %80, %81 : vector<10x128xf32>
    %83 = vector.extract_strided_slice %73 {offsets = [5, 0], sizes = [10, 128], strides = [1, 1]} : vector<16x128xf32> to vector<10x128xf32>
    %84 = arith.addf %82, %83 : vector<10x128xf32>
    %85 = vector.extract_strided_slice %73 {offsets = [6, 0], sizes = [10, 128], strides = [1, 1]} : vector<16x128xf32> to vector<10x128xf32>
    %86 = arith.addf %84, %85 : vector<10x128xf32>
    %c1_i32_20 = arith.constant 1 : i32
    %87 = tpu.dynamic_rotate %86 by %c1_i32_20 dim 1 : vector<10x128xf32>, i32 -> vector<10x128xf32>
    %88 = arith.addf %86, %87 : vector<10x128xf32>
    %c127_i32_21 = arith.constant 127 : i32
    %89 = tpu.dynamic_rotate %86 by %c127_i32_21 dim 1 : vector<10x128xf32>, i32 -> vector<10x128xf32>
    %90 = arith.addf %88, %89 : vector<10x128xf32>
    %c2_i32_22 = arith.constant 2 : i32
    %91 = tpu.dynamic_rotate %86 by %c2_i32_22 dim 1 : vector<10x128xf32>, i32 -> vector<10x128xf32>
    %92 = arith.addf %90, %91 : vector<10x128xf32>
    %c126_i32_23 = arith.constant 126 : i32
    %93 = tpu.dynamic_rotate %86 by %c126_i32_23 dim 1 : vector<10x128xf32>, i32 -> vector<10x128xf32>
    %94 = arith.addf %92, %93 : vector<10x128xf32>
    %c3_i32_24 = arith.constant 3 : i32
    %95 = tpu.dynamic_rotate %86 by %c3_i32_24 dim 1 : vector<10x128xf32>, i32 -> vector<10x128xf32>
    %96 = arith.addf %94, %95 : vector<10x128xf32>
    %c125_i32_25 = arith.constant 125 : i32
    %97 = tpu.dynamic_rotate %86 by %c125_i32_25 dim 1 : vector<10x128xf32>, i32 -> vector<10x128xf32>
    %98 = arith.addf %96, %97 : vector<10x128xf32>
    %99 = vector.broadcast %16 : f32 to vector<10x128xf32>
    %100 = arith.mulf %98, %99 : vector<10x128xf32>
    %101 = arith.mulf %15, %15 : vector<16x128xf32>
    %102 = vector.extract_strided_slice %101 {offsets = [0, 0], sizes = [10, 128], strides = [1, 1]} : vector<16x128xf32> to vector<10x128xf32>
    %103 = vector.extract_strided_slice %101 {offsets = [1, 0], sizes = [10, 128], strides = [1, 1]} : vector<16x128xf32> to vector<10x128xf32>
    %104 = arith.addf %102, %103 : vector<10x128xf32>
    %105 = vector.extract_strided_slice %101 {offsets = [2, 0], sizes = [10, 128], strides = [1, 1]} : vector<16x128xf32> to vector<10x128xf32>
    %106 = arith.addf %104, %105 : vector<10x128xf32>
    %107 = vector.extract_strided_slice %101 {offsets = [3, 0], sizes = [10, 128], strides = [1, 1]} : vector<16x128xf32> to vector<10x128xf32>
    %108 = arith.addf %106, %107 : vector<10x128xf32>
    %109 = vector.extract_strided_slice %101 {offsets = [4, 0], sizes = [10, 128], strides = [1, 1]} : vector<16x128xf32> to vector<10x128xf32>
    %110 = arith.addf %108, %109 : vector<10x128xf32>
    %111 = vector.extract_strided_slice %101 {offsets = [5, 0], sizes = [10, 128], strides = [1, 1]} : vector<16x128xf32> to vector<10x128xf32>
    %112 = arith.addf %110, %111 : vector<10x128xf32>
    %113 = vector.extract_strided_slice %101 {offsets = [6, 0], sizes = [10, 128], strides = [1, 1]} : vector<16x128xf32> to vector<10x128xf32>
    %114 = arith.addf %112, %113 : vector<10x128xf32>
    %c1_i32_26 = arith.constant 1 : i32
    %115 = tpu.dynamic_rotate %114 by %c1_i32_26 dim 1 : vector<10x128xf32>, i32 -> vector<10x128xf32>
    %116 = arith.addf %114, %115 : vector<10x128xf32>
    %c127_i32_27 = arith.constant 127 : i32
    %117 = tpu.dynamic_rotate %114 by %c127_i32_27 dim 1 : vector<10x128xf32>, i32 -> vector<10x128xf32>
    %118 = arith.addf %116, %117 : vector<10x128xf32>
    %c2_i32_28 = arith.constant 2 : i32
    %119 = tpu.dynamic_rotate %114 by %c2_i32_28 dim 1 : vector<10x128xf32>, i32 -> vector<10x128xf32>
    %120 = arith.addf %118, %119 : vector<10x128xf32>
    %c126_i32_29 = arith.constant 126 : i32
    %121 = tpu.dynamic_rotate %114 by %c126_i32_29 dim 1 : vector<10x128xf32>, i32 -> vector<10x128xf32>
    %122 = arith.addf %120, %121 : vector<10x128xf32>
    %c3_i32_30 = arith.constant 3 : i32
    %123 = tpu.dynamic_rotate %114 by %c3_i32_30 dim 1 : vector<10x128xf32>, i32 -> vector<10x128xf32>
    %124 = arith.addf %122, %123 : vector<10x128xf32>
    %c125_i32_31 = arith.constant 125 : i32
    %125 = tpu.dynamic_rotate %114 by %c125_i32_31 dim 1 : vector<10x128xf32>, i32 -> vector<10x128xf32>
    %126 = arith.addf %124, %125 : vector<10x128xf32>
    %127 = vector.broadcast %16 : f32 to vector<10x128xf32>
    %128 = arith.mulf %126, %127 : vector<10x128xf32>
    %129 = arith.mulf %10, %15 : vector<16x128xf32>
    %130 = vector.extract_strided_slice %129 {offsets = [0, 0], sizes = [10, 128], strides = [1, 1]} : vector<16x128xf32> to vector<10x128xf32>
    %131 = vector.extract_strided_slice %129 {offsets = [1, 0], sizes = [10, 128], strides = [1, 1]} : vector<16x128xf32> to vector<10x128xf32>
    %132 = arith.addf %130, %131 : vector<10x128xf32>
    %133 = vector.extract_strided_slice %129 {offsets = [2, 0], sizes = [10, 128], strides = [1, 1]} : vector<16x128xf32> to vector<10x128xf32>
    %134 = arith.addf %132, %133 : vector<10x128xf32>
    %135 = vector.extract_strided_slice %129 {offsets = [3, 0], sizes = [10, 128], strides = [1, 1]} : vector<16x128xf32> to vector<10x128xf32>
    %136 = arith.addf %134, %135 : vector<10x128xf32>
    %137 = vector.extract_strided_slice %129 {offsets = [4, 0], sizes = [10, 128], strides = [1, 1]} : vector<16x128xf32> to vector<10x128xf32>
    %138 = arith.addf %136, %137 : vector<10x128xf32>
    %139 = vector.extract_strided_slice %129 {offsets = [5, 0], sizes = [10, 128], strides = [1, 1]} : vector<16x128xf32> to vector<10x128xf32>
    %140 = arith.addf %138, %139 : vector<10x128xf32>
    %141 = vector.extract_strided_slice %129 {offsets = [6, 0], sizes = [10, 128], strides = [1, 1]} : vector<16x128xf32> to vector<10x128xf32>
    %142 = arith.addf %140, %141 : vector<10x128xf32>
    %c1_i32_32 = arith.constant 1 : i32
    %143 = tpu.dynamic_rotate %142 by %c1_i32_32 dim 1 : vector<10x128xf32>, i32 -> vector<10x128xf32>
    %144 = arith.addf %142, %143 : vector<10x128xf32>
    %c127_i32_33 = arith.constant 127 : i32
    %145 = tpu.dynamic_rotate %142 by %c127_i32_33 dim 1 : vector<10x128xf32>, i32 -> vector<10x128xf32>
    %146 = arith.addf %144, %145 : vector<10x128xf32>
    %c2_i32_34 = arith.constant 2 : i32
    %147 = tpu.dynamic_rotate %142 by %c2_i32_34 dim 1 : vector<10x128xf32>, i32 -> vector<10x128xf32>
    %148 = arith.addf %146, %147 : vector<10x128xf32>
    %c126_i32_35 = arith.constant 126 : i32
    %149 = tpu.dynamic_rotate %142 by %c126_i32_35 dim 1 : vector<10x128xf32>, i32 -> vector<10x128xf32>
    %150 = arith.addf %148, %149 : vector<10x128xf32>
    %c3_i32_36 = arith.constant 3 : i32
    %151 = tpu.dynamic_rotate %142 by %c3_i32_36 dim 1 : vector<10x128xf32>, i32 -> vector<10x128xf32>
    %152 = arith.addf %150, %151 : vector<10x128xf32>
    %c125_i32_37 = arith.constant 125 : i32
    %153 = tpu.dynamic_rotate %142 by %c125_i32_37 dim 1 : vector<10x128xf32>, i32 -> vector<10x128xf32>
    %154 = arith.addf %152, %153 : vector<10x128xf32>
    %155 = vector.broadcast %16 : f32 to vector<10x128xf32>
    %156 = arith.mulf %154, %155 : vector<10x128xf32>
    %157 = arith.mulf %45, %45 : vector<10x128xf32>
    %158 = arith.subf %100, %157 : vector<10x128xf32>
    %159 = vector.broadcast %18 : f32 to vector<10x128xf32>
    %160 = arith.mulf %159, %158 : vector<10x128xf32>
    %161 = arith.mulf %72, %72 : vector<10x128xf32>
    %162 = arith.subf %128, %161 : vector<10x128xf32>
    %163 = vector.broadcast %18 : f32 to vector<10x128xf32>
    %164 = arith.mulf %163, %162 : vector<10x128xf32>
    %165 = arith.mulf %45, %72 : vector<10x128xf32>
    %166 = arith.subf %156, %165 : vector<10x128xf32>
    %167 = vector.broadcast %18 : f32 to vector<10x128xf32>
    %168 = arith.mulf %167, %166 : vector<10x128xf32>
    %cst_38 = arith.constant 2.000000e+00 : f32
    %169 = vector.broadcast %cst_38 : f32 to vector<10x128xf32>
    %170 = arith.mulf %169, %45 : vector<10x128xf32>
    %171 = arith.mulf %170, %72 : vector<10x128xf32>
    %cst_39 = arith.constant 9.99999974E-5 : f32
    %172 = vector.broadcast %cst_39 : f32 to vector<10x128xf32>
    %173 = arith.addf %171, %172 : vector<10x128xf32>
    %cst_40 = arith.constant 2.000000e+00 : f32
    %174 = vector.broadcast %cst_40 : f32 to vector<10x128xf32>
    %175 = arith.mulf %174, %168 : vector<10x128xf32>
    %cst_41 = arith.constant 8.99999984E-4 : f32
    %176 = vector.broadcast %cst_41 : f32 to vector<10x128xf32>
    %177 = arith.addf %175, %176 : vector<10x128xf32>
    %178 = arith.mulf %45, %45 : vector<10x128xf32>
    %179 = arith.mulf %72, %72 : vector<10x128xf32>
    %180 = arith.addf %178, %179 : vector<10x128xf32>
    %cst_42 = arith.constant 9.99999974E-5 : f32
    %181 = vector.broadcast %cst_42 : f32 to vector<10x128xf32>
    %182 = arith.addf %180, %181 : vector<10x128xf32>
    %183 = arith.addf %160, %164 : vector<10x128xf32>
    %cst_43 = arith.constant 8.99999984E-4 : f32
    %184 = vector.broadcast %cst_43 : f32 to vector<10x128xf32>
    %185 = arith.addf %183, %184 : vector<10x128xf32>
    %186 = arith.mulf %173, %177 : vector<10x128xf32>
    %187 = arith.mulf %182, %185 : vector<10x128xf32>
    %188 = arith.divf %186, %187 : vector<10x128xf32>
    %c0_44 = arith.constant 0 : index
    %c0_45 = arith.constant 0 : index
    %189 = vector.load %arg4[%c0_44, %c0_45] : memref<1x128xf32, #tpu.memory_space<vmem>>, vector<1x128xf32>
    %190 = vector.broadcast %189 : vector<1x128xf32> to vector<10x128xf32>
    %191 = arith.mulf %188, %190 : vector<10x128xf32>
    %192 = vector.shape_cast %191 : vector<10x128xf32> to vector<1x10x128xf32>
    %cst_46 = arith.constant dense<0.000000e+00> : vector<1xf32>
    %193 = vector.multi_reduction <add>, %192, %cst_46 [1, 2] : vector<1x10x128xf32> to vector<1xf32>
    %194 = vector.shape_cast %193 : vector<1xf32> to vector<1x1x1xf32>
    %195 = vector.extract %194[0, 0, 0] : f32 from vector<1x1x1xf32>
    %196 = vector.broadcast %195 : f32 to vector<1x1x128xf32>
    %c0_47 = arith.constant 0 : index
    %c0_48 = arith.constant 0 : index
    %c0_49 = arith.constant 0 : index
    %197 = vector.load %arg5[%c0_47, %c0_48, %c0_49] : memref<1x1x128xf32, #tpu.memory_space<vmem>>, vector<1x1x128xf32>
    tpu.vector_store %arg5[%c0_47, %c0_48, %c0_49], %196 {strides = array<i32>} : memref<1x1x128xf32, #tpu.memory_space<vmem>>, vector<1x1x128xf32>,
    return
  }
  func.func @transform_0(%arg0: i32) -> i32 {
    %c0_i32 = arith.constant 0 : i32
    %c0_i32_0 = arith.constant 0 : i32
    return %c0_i32 : i32
  }
  func.func @transform_1(%arg0: i32) -> (i32, i32) {
    %c0_i32 = arith.constant 0 : i32
    %c0_i32_0 = arith.constant 0 : i32
    return %c0_i32, %arg0 : i32, i32
  }
  func.func @transform_2(%arg0: i32) -> (i32, i32) {
    %c0_i32 = arith.constant 0 : i32
    %c0_i32_0 = arith.constant 0 : i32
    return %c0_i32, %arg0 : i32, i32
  }
  func.func @transform_3(%arg0: i32) -> (i32, i32) {
    %c0_i32 = arith.constant 0 : i32
    %c0_i32_0 = arith.constant 0 : i32
    return %c0_i32, %arg0 : i32, i32
  }
  func.func @transform_4(%arg0: i32) -> (i32, i32, i32) {
    %c0_i32 = arith.constant 0 : i32
    %c0_i32_0 = arith.constant 0 : i32
    %c0_i32_1 = arith.constant 0 : i32
    return %arg0, %c0_i32, %c0_i32_0 : i32, i32, i32
  }
}

</mosaic_0001>

<bundles_post_ra>
// kernel: ssim_loss.1
= control target key start
LH: loop header
LB: loop body
LE: loop exit
PB: predicated region body
PF: predicated region fallthrough
CT: control target
= control target key end

     0   :  { %9 = vsyncpa [#allocation3], 0  ;;  %s961_s0 = inlined_call_operand.vmem [shape: f32[2], index: 0, kind: input, shape index: {}]   ;;  %s962_s1 = inlined_call_operand.vmem [shape: f32[16,128], index: 1, kind: input, shape index: {}]   ;;  %s963_s2 = inlined_call_operand.vmem [shape: f32[16,128], index: 2, kind: input, shape index: {}]   ;;  %s964_s3 = inlined_call_operand.vmem [shape: f32[1,128], index: 3, kind: input, shape index: {}]   ;;  %s965_s4 = inlined_call_operand.vmem [shape: f32[1,1,128], index: 4, kind: output, shape index: {}]  }
   0x1   :  { %s16_s17 = sshll.u32 %s961_s0, 4  ;;  %s17_s17 = int_to_ptr.vmem [resolvable:$true] %s16_s17 }
   0x2   :  { %s570_s18 = scalar_lea.vmem %s17_s17, 16  ;;  %p575_p1 = scmp.lt.s32.totalorder %s17_s17, %s17_s17 }
   0x3   :  { %p571_p0 = scmp.ne.s32.totalorder %s17_s17, %s570_s18  ;;  %p576_p2 = scmp.lt.s32.totalorder %s570_s18, %s570_s18 }
   0x5   :  { %p577_p3 = por %p576_p2, %p575_p1 }
   0x7   :  { %p578_p4 = pnand %p577_p3, %p571_p0 }
   0x9   :  { %581 = shalt.err (!%p578_p4)
}
   0xa   :  { %s584_s19 = smov [#allocation2]  }
   0xb   :  { %19 = dma.vmem_to_smem %s17_s17, 16, %s584_s19, [#allocation3]  }
   0xc   :  { %582 = dma.done.wait [#allocation3], 16  }
   0xd   :  { %583 = vsyncadd [#allocation3], 4294967280 }
   0xe   :  { %29 = sfence }
   0xf   :  { %s30_s20 = sld [smem:[#allocation2]]  ;;  %v40_v4 = vld [vmem:[%s962_s1] sm:$0xff]  ;;  %v41_v5 = vld [vmem:[%s962_s1 + $0x8] sm:$0xff]  ;;  %vm56_vm0 = vcmask 1046528   ;;  %s585_s1 = smov 1   ;;  %vm64_vm1 = vcmask 1045504  }
  0x10   :  { %s547_s21 = sld [smem:[#allocation2 + $0x1]]  ;;  %v47_v6 = vld [vmem:[%s963_s2] sm:$0xff]  ;;  %v48_v7 = vld [vmem:[%s963_s2 + $0x8] sm:$0xff]  ;;  %s586_s2 = smov 127   ;;  %vm72_vm2 = vcmask 1044480   ;;  %vm80_vm3 = vcmask 1043456  }
  0x11   :  { %s587_s7 = smov 2   ;;  %s588_s8 = smov 126   ;;  %vm88_vm4 = vcmask 1042432   ;;  %vm96_vm5 = vcmask 1041408  }
  0x12   :  { %s589_s9 = smov 3   ;;  %s590_s10 = smov 125  }
  0x15   :  { %s31_s22 = sadd.f32 1e-06, %s30_s20 }
  0x16   :  { %s36_s23 = sadd.f32 1e-06, %s547_s21 }
  0x17   :  { %v32_v0 = vstv %s31_s22 }
  0x18   :  { %562 = vrcp.f32 %v32_v0  ;;  %v37_v1 = vstv %s36_s23 }
  0x19   :  { %564 = vrcp.f32 %v37_v1 }
  0x25   :  { %v563_v2 = vpop.eup %562 }
  0x26   :  { %v565_v3 = vpop.eup %564  ;;  %549 = vpush %v563_v2 }
  0x27   :  { %551 = vpush %v565_v3 }
  0x57   :  { %s550_s27 = spop %549 }
  0x58   :  { %v42_v8 = vstv %s550_s27  ;;  %s552_s6 = spop %551 }
  0x59   :  { %v43_v9 = vmul.f32 %v42_v8, %v40_v4  ;;  %v44_v10 = vmul.f32 %v42_v8, %v41_v5  ;;  %v49_v11 = vstv %s552_s6 }
  0x5a   :  { %v50_v12 = vmul.f32 %v49_v11, %v47_v6  ;;  %v51_v13 = vmul.f32 %v49_v11, %v48_v7 }
  0x5b   :  { %v631_v14 = vadd.f32 1e-06, %v43_v9  ;;  %v633_v15 = vadd.f32 1e-06, %v44_v10 }
  0x5c   :  { %v635_v16 = vadd.f32 1e-06, %v50_v12  ;;  %v637_v17 = vadd.f32 1e-06, %v51_v13 }
  0x5d   :  { %v58_v18 = vrot.slane %v633_v15, 1  ;;  %v66_v22 = vrot.slane %v633_v15, 2  ;;  %v74_v26 = vrot.slane %v633_v15, 3  ;;  %v82_v29 = vrot.slane %v633_v15, 4 }
  0x5e   :  { %v642_v19 = vmul.f32 %v635_v16, %v631_v14  ;;  %v646_v20 = vmul.f32 %v637_v17, %v633_v15  ;;  %v145_v23 = vrot.slane %v637_v17, 1  ;;  %v152_v24 = vrot.slane %v637_v17, 2 }
  0x5f   :  { %v63_v21 = vadd.f32 %v58_v18, %v633_v15  ;;  %v159_v31 = vrot.slane %v637_v17, 3  ;;  %v90_v33 = vrot.slane %v633_v15, 5  ;;  %v57_v34 = vrot.slane %v631_v14, 1 }
  0x60   :  { %v150_v27 = vadd.f32 %v145_v23, %v637_v17  ;;  %v166_v36 = vrot.slane %v637_v17, 4  ;;  %v98_v38 = vrot.slane %v633_v15, 6  ;;  %v173_v40 = vrot.slane %v637_v17, 5 }
  0x61   :  { %v71_v25 = vadd.f32 %v66_v22, %v63_v21  ;;  %v59_v42 = vsel %vm56_vm0, %v57_v34, %v58_v18  ;;  %v144_v43 = vrot.slane %v635_v16, 1  ;;  %v180_v45 = vrot.slane %v637_v17, 6 }
  0x62   :  { %v157_v30 = vadd.f32 %v152_v24, %v150_v27  ;;  %v65_v46 = vrot.slane %v631_v14, 2  ;;  %v62_v48 = vadd.f32 %v59_v42, %v631_v14  ;;  %v151_v50 = vrot.slane %v635_v16, 2 }
  0x63   :  { %v79_v28 = vadd.f32 %v74_v26, %v71_v25  ;;  %v146_v49 = vsel %vm56_vm0, %v144_v43, %v145_v23  ;;  %v73_v52 = vrot.slane %v631_v14, 3  ;;  %v81_v57 = vrot.slane %v631_v14, 4 }
  0x64   :  { %v164_v35 = vadd.f32 %v159_v31, %v157_v30  ;;  %v67_v51 = vsel %vm64_vm1, %v65_v46, %v66_v22  ;;  %v149_v54 = vadd.f32 %v146_v49, %v635_v16  ;;  %v153_v55 = vsel %vm64_vm1, %v151_v50, %v152_v24 }
  0x65   :  { %v87_v32 = vadd.f32 %v82_v29, %v79_v28  ;;  %v70_v53 = vadd.f32 %v67_v51, %v62_v48  ;;  %v75_v56 = vsel %vm72_vm2, %v73_v52, %v74_v26  ;;  %v158_v58 = vrot.slane %v635_v16, 3 }
  0x66   :  { %v171_v39 = vadd.f32 %v166_v36, %v164_v35  ;;  %v156_v60 = vadd.f32 %v153_v55, %v149_v54  ;;  %v89_v61 = vrot.slane %v631_v14, 5  ;;  %v83_v62 = vsel %vm80_vm3, %v81_v57, %v82_v29 }
  0x67   :  { %v95_v37 = vadd.f32 %v90_v33, %v87_v32  ;;  %v78_v59 = vadd.f32 %v75_v56, %v70_v53  ;;  %v97_v63 = vrot.slane %v631_v14, 6  ;;  %v160_v0 = vsel %vm72_vm2, %v158_v58, %v159_v31 }
  0x68   :  { %v178_v44 = vadd.f32 %v173_v40, %v171_v39  ;;  %v165_v1 = vrot.slane %v635_v16, 4  ;;  %v163_v3 = vadd.f32 %v160_v0, %v156_v60  ;;  %v704_v4 = vmul.f32 %v633_v15, %v633_v15 }
  0x69   :  { %v661_v41 = vadd.f32 %v98_v38, %v95_v37  ;;  %v86_v2 = vadd.f32 %v83_v62, %v78_v59  ;;  %v708_v5 = vmul.f32 %v637_v17, %v637_v17  ;;  %v91_v6 = vsel %vm88_vm4, %v89_v61, %v90_v33 }
  0x6a   :  { %v673_v47 = vadd.f32 %v180_v45, %v178_v44  ;;  %v172_v7 = vrot.slane %v635_v16, 5  ;;  %v99_v8 = vsel %vm96_vm5, %v97_v63, %v98_v38  ;;  %v167_v9 = vsel %vm80_vm3, %v165_v1, %v166_v36 }
  0x6b   :  { %106 = vrot.lane.b32.xlu0 %v661_v41, %s585_s1  ;;  %v397_v10 = vrot.slane %v646_v20, 1  ;;  %v404_v11 = vrot.slane %v646_v20, 2  ;;  %v94_v12 = vadd.f32 %v91_v6, %v86_v2  ;;  %v170_v13 = vadd.f32 %v167_v9, %v163_v3 }
  0x6c   :  { %194 = vrot.lane.b32.xlu1 %v673_v47, %s586_s2  ;;  %v411_v15 = vrot.slane %v646_v20, 3  ;;  %v418_v18 = vrot.slane %v646_v20, 4  ;;  %v425_v21 = vrot.slane %v646_v20, 5  ;;  %v432_v22 = vrot.slane %v646_v20, 6 }
  0x6d   :  { %v396_v23 = vrot.slane %v642_v19, 1  ;;  %v403_v24 = vrot.slane %v642_v19, 2  ;;  %v174_v25 = vsel %vm88_vm4, %v172_v7, %v173_v40  ;;  %v179_v26 = vrot.slane %v635_v16, 6 }
  0x6e   :  { %v410_v27 = vrot.slane %v642_v19, 3  ;;  %v417_v28 = vrot.slane %v642_v19, 4  ;;  %v424_v31 = vrot.slane %v642_v19, 5  ;;  %v431_v32 = vrot.slane %v642_v19, 6 }
  0x6f   :  { %188 = vrot.lane.b32.xlu0 %v673_v47, %s585_s1  ;;  %v398_v29 = vsel %vm56_vm0, %v396_v23, %v397_v10  ;;  %v405_v30 = vsel %vm64_vm1, %v403_v24, %v404_v11  ;;  %v744_v33 = vadd.f32 %v99_v8, %v94_v12  ;;  %v177_v34 = vadd.f32 %v174_v25, %v170_v13 }
  0x70   :  { %200 = vrot.lane.b32.xlu1 %v673_v47, %s587_s7  ;;  %v401_v35 = vadd.f32 %v398_v29, %v642_v19  ;;  %v412_v36 = vsel %vm72_vm2, %v410_v27, %v411_v15  ;;  %v229_v37 = vrot.slane %v704_v4, 1  ;;  %v419_v38 = vsel %vm80_vm3, %v417_v28, %v418_v18 }
  0x71   :  { %v426_v39 = vsel %vm88_vm4, %v424_v31, %v425_v21  ;;  %v433_v40 = vsel %vm96_vm5, %v431_v32, %v432_v22  ;;  %v181_v42 = vsel %vm96_vm5, %v179_v26, %v180_v45  ;;  %v313_v44 = vrot.slane %v708_v5, 1 }
  0x72   :  { %v408_v19 = vadd.f32 %v405_v30, %v401_v35  ;;  %v767_v43 = vadd.f32 %v181_v42, %v177_v34  ;;  %v234_v48 = vadd.f32 %v229_v37, %v704_v4  ;;  %v236_v50 = vrot.slane %v704_v4, 2 }
  0x73   :  { %112 = vrot.lane.b32.xlu0 %v661_v41, %s586_s2  ;;  %v318_v17 = vadd.f32 %v313_v44, %v708_v5  ;;  %v320_v45 = vrot.slane %v708_v5, 2  ;;  %v243_v54 = vrot.slane %v704_v4, 3  ;;  %v327_v57 = vrot.slane %v708_v5, 3 }
  0x74   :  { %206 = vrot.lane.b32.xlu1 %v673_v47, %s588_s8  ;;  %v415_v46 = vadd.f32 %v412_v36, %v408_v19  ;;  %v241_v52 = vadd.f32 %v236_v50, %v234_v48  ;;  %v250_v58 = vrot.slane %v704_v4, 4  ;;  %v224_v61 = vmul.f32 %v631_v14, %v631_v14 }
  0x75   :  { %v325_v55 = vadd.f32 %v320_v45, %v318_v17  ;;  %v334_v62 = vrot.slane %v708_v5, 4  ;;  %v257_v63 = vrot.slane %v704_v4, 5  ;;  %v308_v1 = vmul.f32 %v635_v16, %v635_v16 }
  0x76   :  { %v422_v49 = vadd.f32 %v419_v38, %v415_v46  ;;  %v248_v56 = vadd.f32 %v243_v54, %v241_v52  ;;  %v341_v14 = vrot.slane %v708_v5, 5  ;;  %v228_v3 = vrot.slane %v224_v61, 1 }
  0x77   :  { %118 = vrot.lane.b32.xlu0 %v661_v41, %s587_s7  ;;  %v332_v59 = vadd.f32 %v327_v57, %v325_v55  ;;  %v264_v6 = vrot.slane %v704_v4, 6  ;;  %v312_v9 = vrot.slane %v308_v1, 1  ;;  %v348_v16 = vrot.slane %v708_v5, 6 }
  0x78   :  { %212 = vrot.lane.b32.xlu1 %v673_v47, %s589_s9  ;;  %v429_v51 = vadd.f32 %v426_v39, %v422_v49  ;;  %v255_v60 = vadd.f32 %v250_v58, %v248_v56  ;;  %v230_v12 = vsel %vm56_vm0, %v228_v3, %v229_v37  ;;  %v235_v23 = vrot.slane %v224_v61, 2 }
  0x79   :  { %v339_v0 = vadd.f32 %v334_v62, %v332_v59  ;;  %v233_v24 = vadd.f32 %v230_v12, %v224_v61  ;;  %v314_v4 = vsel %vm56_vm0, %v312_v9, %v313_v44  ;;  %v319_v25 = vrot.slane %v308_v1, 2 }
  0x7a   :  { %v780_v53 = vadd.f32 %v433_v40, %v429_v51  ;;  %v262_v2 = vadd.f32 %v257_v63, %v255_v60  ;;  %v237_v5 = vsel %vm64_vm1, %v235_v23, %v236_v50  ;;  %v242_v26 = vrot.slane %v224_v61, 3 }
  0x7b   :  { %124 = vrot.lane.b32.xlu0 %v661_v41, %s588_s8  ;;  %v346_v7 = vadd.f32 %v341_v14, %v339_v0  ;;  %v317_v27 = vadd.f32 %v314_v4, %v308_v1  ;;  %v240_v28 = vadd.f32 %v237_v5, %v233_v24  ;;  %v321_v29 = vsel %vm64_vm1, %v319_v25, %v320_v45 }
  0x7c   :  { %218 = vrot.lane.b32.xlu1 %v673_v47, %s590_s10  ;;  %v807_v8 = vadd.f32 %v264_v6, %v262_v2  ;;  %v326_v30 = vrot.slane %v308_v1, 3  ;;  %v244_v31 = vsel %vm72_vm2, %v242_v26, %v243_v54  ;;  %v249_v32 = vrot.slane %v224_v61, 4 }
  0x7d   :  { %v815_v13 = vadd.f32 %v348_v16, %v346_v7  ;;  %v324_v34 = vadd.f32 %v321_v29, %v317_v27  ;;  %v247_v35 = vadd.f32 %v244_v31, %v240_v28  ;;  %v333_v37 = vrot.slane %v308_v1, 4 }
  0x7e   :  { %v328_v36 = vsel %vm72_vm2, %v326_v30, %v327_v57  ;;  %v251_v38 = vsel %vm80_vm3, %v249_v32, %v250_v58  ;;  %v256_v39 = vrot.slane %v224_v61, 5  ;;  %v340_v44 = vrot.slane %v308_v1, 5 }
  0x7f   :  { %130 = vrot.lane.b32.xlu0 %v661_v41, %s589_s9  ;;  %v331_v40 = vadd.f32 %v328_v36, %v324_v34  ;;  %v254_v19 = vadd.f32 %v251_v38, %v247_v35  ;;  %v335_v42 = vsel %vm80_vm3, %v333_v37, %v334_v62  ;;  %v263_v48 = vrot.slane %v224_v61, 6 }
  0x80   :  { %104 = vrot.lane.b32.xlu1 %v744_v33, %s585_s1  ;;  %v258_v46 = vsel %vm88_vm4, %v256_v39, %v257_v63  ;;  %v342_v17 = vsel %vm88_vm4, %v340_v44, %v341_v14  ;;  %v347_v45 = vrot.slane %v308_v1, 6  ;;  %v402_v57 = vadd.f32 %v397_v10, %v646_v20 }
  0x81   :  { %v338_v49 = vadd.f32 %v335_v42, %v331_v40  ;;  %v261_v50 = vadd.f32 %v258_v46, %v254_v19  ;;  %v265_v51 = vsel %vm96_vm5, %v263_v48, %v264_v6 }
  0x82   :  { %v349_v55 = vsel %vm96_vm5, %v347_v45, %v348_v16  ;;  %v409_v58 = vadd.f32 %v404_v11, %v402_v57 }
  0x83   :  { %136 = vrot.lane.b32.xlu0 %v661_v41, %s590_s10  ;;  %v345_v52 = vadd.f32 %v342_v17, %v338_v49  ;;  %v847_v54 = vadd.f32 %v265_v51, %v261_v50 }
  0x84   :  { %186 = vrot.lane.b32.xlu1 %v767_v43, %s585_s1  ;;  %v416_v59 = vadd.f32 %v411_v15, %v409_v58 }
  0x85   :  { %v854_v56 = vadd.f32 %v349_v55, %v345_v52 }
  0x86   :  { %v423_v10 = vadd.f32 %v418_v18, %v416_v59 }
  0x87   :  { %110 = vrot.lane.b32.xlu0 %v744_v33, %s586_s2 }
  0x88   :  { %192 = vrot.lane.b32.xlu1 %v767_v43, %s586_s2  ;;  %v430_v11 = vadd.f32 %v425_v21, %v423_v10 }
  0x8a   :  { %v889_v15 = vadd.f32 %v432_v22, %v430_v11 }
  0x8b   :  { %116 = vrot.lane.b32.xlu0 %v744_v33, %s587_s7 }
  0x8c   :  { %198 = vrot.lane.b32.xlu1 %v767_v43, %s587_s7 }
  0x8f   :  { %122 = vrot.lane.b32.xlu0 %v744_v33, %s588_s8 }
  0x90   :  { %204 = vrot.lane.b32.xlu1 %v767_v43, %s588_s8 }
  0x93   :  { %128 = vrot.lane.b32.xlu0 %v744_v33, %s589_s9 }
  0x94   :  { %210 = vrot.lane.b32.xlu1 %v767_v43, %s589_s9 }
  0x97   :  { %134 = vrot.lane.b32.xlu0 %v744_v33, %s590_s10 }
  0x98   :  { %216 = vrot.lane.b32.xlu1 %v767_v43, %s590_s10 }
  0x9b   :  { %272 = vrot.lane.b32.xlu0 %v807_v8, %s585_s1 }
  0x9c   :  { %356 = vrot.lane.b32.xlu1 %v815_v13, %s585_s1 }
  0x9f   :  { %278 = vrot.lane.b32.xlu0 %v807_v8, %s586_s2 }
  0xa0   :  { %362 = vrot.lane.b32.xlu1 %v815_v13, %s586_s2 }
  0xa3   :  { %284 = vrot.lane.b32.xlu0 %v807_v8, %s587_s7 }
  0xa4   :  { %368 = vrot.lane.b32.xlu1 %v815_v13, %s587_s7 }
  0xa7   :  { %290 = vrot.lane.b32.xlu0 %v807_v8, %s588_s8 }
  0xa8   :  { %374 = vrot.lane.b32.xlu1 %v815_v13, %s588_s8 }
  0xab   :  { %296 = vrot.lane.b32.xlu0 %v807_v8, %s589_s9 }
  0xac   :  { %380 = vrot.lane.b32.xlu1 %v815_v13, %s589_s9 }
  0xaf   :  { %302 = vrot.lane.b32.xlu0 %v807_v8, %s590_s10 }
  0xb0   :  { %386 = vrot.lane.b32.xlu1 %v815_v13, %s590_s10 }
  0xb3   :  { %270 = vrot.lane.b32.xlu0 %v847_v54, %s585_s1 }
  0xb4   :  { %354 = vrot.lane.b32.xlu1 %v854_v56, %s585_s1 }
  0xb7   :  { %276 = vrot.lane.b32.xlu0 %v847_v54, %s586_s2 }
  0xb8   :  { %360 = vrot.lane.b32.xlu1 %v854_v56, %s586_s2 }
  0xbb   :  { %282 = vrot.lane.b32.xlu0 %v847_v54, %s587_s7 }
  0xbc   :  { %366 = vrot.lane.b32.xlu1 %v854_v56, %s587_s7 }
  0xbf   :  { %288 = vrot.lane.b32.xlu0 %v847_v54, %s588_s8 }
  0xc0   :  { %372 = vrot.lane.b32.xlu1 %v854_v56, %s588_s8 }
  0xc3   :  { %294 = vrot.lane.b32.xlu0 %v847_v54, %s589_s9 }
  0xc4   :  { %378 = vrot.lane.b32.xlu1 %v854_v56, %s589_s9 }
  0xc7   :  { %300 = vrot.lane.b32.xlu0 %v847_v54, %s590_s10 }
  0xc8   :  { %384 = vrot.lane.b32.xlu1 %v854_v56, %s590_s10 }
  0xcb   :  { %440 = vrot.lane.b32.xlu0 %v889_v15, %s585_s1 }
  0xcc   :  { %438 = vrot.lane.b32.xlu1 %v780_v53, %s585_s1 }
  0xcf   :  { %446 = vrot.lane.b32.xlu0 %v889_v15, %s586_s2 }
  0xd0   :  { %444 = vrot.lane.b32.xlu1 %v780_v53, %s586_s2 }
  0xd3   :  { %452 = vrot.lane.b32.xlu0 %v889_v15, %s587_s7 }
  0xd4   :  { %450 = vrot.lane.b32.xlu1 %v780_v53, %s587_s7 }
  0xd7   :  { %458 = vrot.lane.b32.xlu0 %v889_v15, %s588_s8 }
  0xd8   :  { %456 = vrot.lane.b32.xlu1 %v780_v53, %s588_s8 }
  0xdb   :  { %464 = vrot.lane.b32.xlu0 %v889_v15, %s589_s9 }
  0xdc   :  { %462 = vrot.lane.b32.xlu1 %v780_v53, %s589_s9 }
  0xdd   :  { %v107_v20 = vpop.permute.xlu0 %106 }
  0xde   :  { %v195_v18 = vpop.permute.xlu1 %194  ;;  %v109_v60 = vadd.f32 %v107_v20, %v661_v41 }
  0xdf   :  { %470 = vrot.lane.b32.xlu0 %v889_v15, %s590_s10 }
  0xe0   :  { %468 = vrot.lane.b32.xlu1 %v780_v53, %s590_s10 }
  0xe1   :  { %v189_v21 = vpop.permute.xlu0 %188 }
  0xe2   :  { %v191_v22 = vadd.f32 %v189_v21, %v673_v47  ;;  %v201_v61 = vpop.permute.xlu1 %200 }
  0xe4   :  { %v197_v62 = vadd.f32 %v195_v18, %v191_v22 }
  0xe5   :  { %v113_v63 = vpop.permute.xlu0 %112 }
  0xe6   :  { %v203_v0 = vadd.f32 %v201_v61, %v197_v62  ;;  %v115_v1 = vadd.f32 %v113_v63, %v109_v60  ;;  %v207_v2 = vpop.permute.xlu1 %206 }
  0xe8   :  { %v209_v14 = vadd.f32 %v207_v2, %v203_v0 }
  0xe9   :  { %v119_v3 = vpop.permute.xlu0 %118 }
  0xea   :  { %v121_v6 = vadd.f32 %v119_v3, %v115_v1  ;;  %v213_v7 = vpop.permute.xlu1 %212 }
  0xeb   :  { %v215_v9 = vadd.f32 %v213_v7, %v209_v14 }
  0xed   :  { %v125_v16 = vpop.permute.xlu0 %124 }
  0xee   :  { %v127_v12 = vadd.f32 %v125_v16, %v121_v6  ;;  %v219_v23 = vpop.permute.xlu1 %218 }
  0xef   :  { %v221_v24 = vadd.f32 %v219_v23, %v215_v9 }
  0xf1   :  { %v131_v4 = vpop.permute.xlu0 %130  ;;  %v223_v5 = vmul.f32 0.020408163, %v221_v24 }
  0xf2   :  { %v133_v25 = vadd.f32 %v131_v4, %v127_v12  ;;  %v105_v47 = vpop.permute.xlu1 %104 }
  0xf3   :  { %v108_v27 = vadd.f32 %v105_v47, %v744_v33  ;;  %v920_v31 = vmul.f32 %v223_v5, %v223_v5 }
  0xf5   :  { %v137_v41 = vpop.permute.xlu0 %136 }
  0xf6   :  { %v139_v26 = vadd.f32 %v137_v41, %v133_v25  ;;  %v187_v29 = vpop.permute.xlu1 %186 }
  0xf7   :  { %v190_v37 = vadd.f32 %v187_v29, %v767_v43 }
  0xf8   :  { %v141_v28 = vmul.f32 0.020408163, %v139_v26 }
  0xf9   :  { %v111_v30 = vpop.permute.xlu0 %110 }
  0xfa   :  { %v495_v32 = vmul.f32 2.0, %v141_v28  ;;  %v114_v34 = vadd.f32 %v111_v30, %v108_v27  ;;  %v477_v35 = vmul.f32 %v141_v28, %v141_v28  ;;  %v922_v36 = vmul.f32 %v223_v5, %v141_v28  ;;  %v193_v39 = vpop.permute.xlu1 %192 }
  0xfb   :  { %v196_v19 = vadd.f32 %v193_v39, %v190_v37 }
  0xfc   :  { %v925_v38 = vmul.f32 %v495_v32, %v223_v5  ;;  %v505_v40 = vadd.f32 %v920_v31, %v477_v35 }
  0xfd   :  { %v117_v42 = vpop.permute.xlu0 %116 }
  0xfe   :  { %v199_v33 = vpop.permute.xlu1 %198  ;;  %v120_v46 = vadd.f32 %v117_v42, %v114_v34 }
  0xff   :  { %v202_v17 = vadd.f32 %v199_v33, %v196_v19 }
 0x101   :  { %v123_v44 = vpop.permute.xlu0 %122 }
 0x102   :  { %v205_v48 = vpop.permute.xlu1 %204  ;;  %v126_v50 = vadd.f32 %v123_v44, %v120_v46 }
 0x103   :  { %v208_v52 = vadd.f32 %v205_v48, %v202_v17 }
 0x105   :  { %v129_v49 = vpop.permute.xlu0 %128 }
 0x106   :  { %v132_v45 = vadd.f32 %v129_v49, %v126_v50  ;;  %v211_v51 = vpop.permute.xlu1 %210  ;;  %v507_v49 = vadd.f32 0.0001, %v505_v40 }
 0x107   :  { %v214_v43 = vadd.f32 %v211_v51, %v208_v52 }
 0x109   :  { %v135_v55 = vpop.permute.xlu0 %134 }
 0x10a   :  { %v138_v57 = vadd.f32 %v135_v55, %v132_v45  ;;  %v217_v59 = vpop.permute.xlu1 %216 }
 0x10b   :  { %v220_v10 = vadd.f32 %v217_v59, %v214_v43 }
 0x10c   :  { %v140_v58 = vmul.f32 0.020408163, %v138_v57 }
 0x10d   :  { %v273_v11 = vpop.permute.xlu0 %272  ;;  %v222_v18 = vmul.f32 0.020408163, %v220_v10 }
 0x10e   :  { %v494_v20 = vmul.f32 2.0, %v140_v58  ;;  %v928_v21 = vmul.f32 %v140_v58, %v140_v58  ;;  %v357_v22 = vpop.permute.xlu1 %356  ;;  %v275_v14 = vadd.f32 %v273_v11, %v807_v8 }
 0x10f   :  { %v932_v62 = vmul.f32 %v222_v18, %v222_v18  ;;  %v934_v63 = vmul.f32 %v222_v18, %v140_v58  ;;  %v359_v9 = vadd.f32 %v357_v22, %v815_v13 }
 0x110   :  { %v930_v60 = vmul.f32 %v494_v20, %v222_v18 }
 0x111   :  { %v279_v61 = vpop.permute.xlu0 %278  ;;  %v938_v0 = vadd.f32 %v932_v62, %v928_v21 }
 0x112   :  { %v363_v1 = vpop.permute.xlu1 %362  ;;  %v281_v7 = vadd.f32 %v279_v61, %v275_v14 }
 0x113   :  { %v365_v23 = vadd.f32 %v363_v1, %v359_v9 }
 0x115   :  { %v285_v2 = vpop.permute.xlu0 %284 }
 0x116   :  { %v369_v3 = vpop.permute.xlu1 %368  ;;  %v287_v16 = vadd.f32 %v285_v2, %v281_v7 }
 0x117   :  { %v371_v25 = vadd.f32 %v369_v3, %v365_v23 }
 0x119   :  { %v291_v6 = vpop.permute.xlu0 %290 }
 0x11a   :  { %v375_v12 = vpop.permute.xlu1 %374  ;;  %v293_v4 = vadd.f32 %v291_v6, %v287_v16 }
 0x11b   :  { %v377_v41 = vadd.f32 %v375_v12, %v371_v25  ;;  %v506_v25 = vadd.f32 0.0001, %v938_v0 }
 0x11d   :  { %v297_v24 = vpop.permute.xlu0 %296 }
 0x11e   :  { %v299_v47 = vadd.f32 %v297_v24, %v293_v4  ;;  %v381_v5 = vpop.permute.xlu1 %380 }
 0x11f   :  { %v383_v28 = vadd.f32 %v381_v5, %v377_v41 }
 0x121   :  { %v303_v26 = vpop.permute.xlu0 %302 }
 0x122   :  { %v305_v27 = vadd.f32 %v303_v26, %v299_v47  ;;  %v387_v30 = vpop.permute.xlu1 %386 }
 0x123   :  { %v389_v8 = vadd.f32 %v387_v30, %v383_v28 }
 0x124   :  { %v307_v29 = vmul.f32 0.020408163, %v305_v27 }
 0x125   :  { %v271_v32 = vpop.permute.xlu0 %270  ;;  %v391_v37 = vmul.f32 0.020408163, %v389_v8 }
 0x126   :  { %v479_v34 = vsub.f32 %v307_v29, %v477_v35  ;;  %v355_v39 = vpop.permute.xlu1 %354  ;;  %v274_v17 = vadd.f32 %v271_v32, %v847_v54 }
 0x127   :  { %v485_v19 = vsub.f32 %v391_v37, %v920_v31  ;;  %v358_v35 = vadd.f32 %v355_v39, %v854_v56 }
 0x128   :  { %v481_v13 = vmul.f32 1.0208334, %v479_v34 }
 0x129   :  { %v277_v42 = vpop.permute.xlu0 %276  ;;  %v487_v33 = vmul.f32 1.0208334, %v485_v19 }
 0x12a   :  { %v361_v44 = vpop.permute.xlu1 %360  ;;  %v280_v55 = vadd.f32 %v277_v42, %v274_v17 }
 0x12b   :  { %v509_v46 = vadd.f32 %v487_v33, %v481_v13  ;;  %v364_v58 = vadd.f32 %v361_v44, %v358_v35 }
 0x12d   :  { %v283_v48 = vpop.permute.xlu0 %282  ;;  %v511_v50 = vadd.f32 0.0009, %v509_v46 }
 0x12e   :  { %v367_v45 = vpop.permute.xlu1 %366  ;;  %v286_v57 = vadd.f32 %v283_v48, %v280_v55 }
 0x12f   :  { %v515_v51 = vmul.f32 %v511_v50, %v507_v49  ;;  %v370_v10 = vadd.f32 %v367_v45, %v364_v58  ;;  %v499_v45 = vadd.f32 0.0001, %v925_v38  ;;  %v548_v58 = vld [vmem:[%s964_s3] ss:$0 sm:$0xff] }
 0x131   :  { %v289_v52 = vpop.permute.xlu0 %288  ;;  %566 = vrcp.f32 %v515_v51 }
 0x132   :  { %v373_v43 = vpop.permute.xlu1 %372  ;;  %v292_v31 = vadd.f32 %v289_v52, %v286_v57  ;;  %v498_v57 = vadd.f32 0.0001, %v930_v60 }
 0x133   :  { %v376_v18 = vadd.f32 %v373_v43, %v370_v10 }
 0x135   :  { %v295_v59 = vpop.permute.xlu0 %294 }
 0x136   :  { %v298_v11 = vadd.f32 %v295_v59, %v292_v31  ;;  %v379_v20 = vpop.permute.xlu1 %378 }
 0x137   :  { %v382_v61 = vadd.f32 %v379_v20, %v376_v18 }
 0x139   :  { %v301_v22 = vpop.permute.xlu0 %300 }
 0x13a   :  { %v304_v40 = vadd.f32 %v301_v22, %v298_v11  ;;  %v385_v54 = vpop.permute.xlu1 %384 }
 0x13b   :  { %v388_v2 = vadd.f32 %v385_v54, %v382_v61 }
 0x13c   :  { %v306_v1 = vmul.f32 0.020408163, %v304_v40 }
 0x13d   :  { %v441_v14 = vpop.permute.xlu0 %440  ;;  %v390_v6 = vmul.f32 0.020408163, %v388_v2 }
 0x13e   :  { %v478_v3 = vsub.f32 %v306_v1, %v928_v21  ;;  %v439_v56 = vpop.permute.xlu1 %438  ;;  %v443_v5 = vadd.f32 %v441_v14, %v889_v15  ;;  %v567_v51 = vpop.eup %566 }
 0x13f   :  { %v484_v9 = vsub.f32 %v390_v6, %v932_v62  ;;  %v442_v21 = vadd.f32 %v439_v56, %v780_v53 }
 0x140   :  { %v480_v7 = vmul.f32 1.0208334, %v478_v3 }
 0x141   :  { %v447_v16 = vpop.permute.xlu0 %446  ;;  %v486_v12 = vmul.f32 1.0208334, %v484_v9 }
 0x142   :  { %v445_v23 = vpop.permute.xlu1 %444  ;;  %v449_v28 = vadd.f32 %v447_v16, %v443_v5 }
 0x143   :  { %v508_v24 = vadd.f32 %v486_v12, %v480_v7  ;;  %v448_v8 = vadd.f32 %v445_v23, %v442_v21 }
 0x145   :  { %v453_v4 = vpop.permute.xlu0 %452  ;;  %v510_v47 = vadd.f32 0.0009, %v508_v24 }
 0x146   :  { %v451_v41 = vpop.permute.xlu1 %450  ;;  %v455_v29 = vadd.f32 %v453_v4, %v449_v28 }
 0x147   :  { %v514_v26 = vmul.f32 %v510_v47, %v506_v25  ;;  %v454_v34 = vadd.f32 %v451_v41, %v448_v8 }
 0x149   :  { %v459_v27 = vpop.permute.xlu0 %458  ;;  %568 = vrcp.f32 %v514_v26 }
 0x14a   :  { %v457_v30 = vpop.permute.xlu1 %456  ;;  %v461_v32 = vadd.f32 %v459_v27, %v455_v29 }
 0x14b   :  { %v460_v13 = vadd.f32 %v457_v30, %v454_v34 }
 0x14d   :  { %v465_v62 = vpop.permute.xlu0 %464 }
 0x14e   :  { %v467_v37 = vadd.f32 %v465_v62, %v461_v32  ;;  %v463_v39 = vpop.permute.xlu1 %462 }
 0x14f   :  { %v466_v42 = vadd.f32 %v463_v39, %v460_v13 }
 0x151   :  { %v471_v19 = vpop.permute.xlu0 %470 }
 0x152   :  { %v473_v0 = vadd.f32 %v471_v19, %v467_v37  ;;  %v469_v33 = vpop.permute.xlu1 %468 }
 0x153   :  { %v472_v44 = vadd.f32 %v469_v33, %v466_v42 }
 0x154   :  { %v475_v15 = vmul.f32 0.020408163, %v473_v0 }
 0x155   :  { %v474_v53 = vmul.f32 0.020408163, %v472_v44 }
 0x156   :  { %v491_v46 = vsub.f32 %v475_v15, %v922_v36  ;;  %v569_v31 = vpop.eup %568 }
 0x157   :  { %v490_v49 = vsub.f32 %v474_v53, %v934_v63 }
 0x158   :  { %v493_v48 = vmul.f32 1.0208334, %v491_v46 }
 0x159   :  { %v492_v17 = vmul.f32 1.0208334, %v490_v49 }
 0x15a   :  { %v501_v50 = vmul.f32 2.0, %v493_v48 }
 0x15b   :  { %v500_v55 = vmul.f32 2.0, %v492_v17 }
 0x15c   :  { %v503_v52 = vadd.f32 0.0009, %v501_v50 }
 0x15d   :  { %v502_v43 = vadd.f32 0.0009, %v500_v55 }
 0x15e   :  { %v513_v35 = vmul.f32 %v503_v52, %v499_v45 }
 0x15f   :  { %v512_v59 = vmul.f32 %v502_v43, %v498_v57 }
 0x160   :  { %v519_v36 = vmul.f32 %v567_v51, %v513_v35 }
 0x161   :  { %v517_v63 = vmul.f32 %v569_v31, %v512_v59 }
 0x162   :  { %v528_v10 = vmul.f32 %v548_v58, %v519_v36 }
 0x163   :  { %v527_v20 = vmul.f32 %v548_v58, %v517_v63 }
 0x164   :  { %v529_v11 = vsel %vm96_vm5, %v528_v10, 0.0 }
 0x165   :  { %v530_v38 = vadd.f32 %v529_v11, %v527_v20 }
 0x167   :  { %531 = vadd.xlane.f32.xlu0 %v530_v38 }
 0x1f0   :  { %v532_v18 = vpop.xlane.xlu0 %531 }
 0x1f1   :  { %v533_v22 = vrot.slane %v532_v18, 4 }
 0x1f3   :  { %v534_v40 = vadd.f32 %v533_v22, %v532_v18 }
 0x1f5   :  { %v535_v61 = vrot.slane %v534_v40, 2 }
 0x1f7   :  { %v536_v60 = vadd.f32 %v535_v61, %v534_v40 }
 0x1f9   :  { %v537_v1 = vrot.slane %v536_v60, 1 }
 0x1fb   :  { %v538_v54 = vadd.f32 %v537_v1, %v536_v60 }
 0x1fd   :  { %553 = vpush %v538_v54 }
 0x22e   :  { %s554_s13 = spop %553 }
 0x22f   :  { %v540_v2 = vstv %s554_s13 }
 0x230   :  { %541 = vst [vmem:[%s965_s4] sm:$0x1] %v540_v2 }
 0x231   :  { %546 = vsyncpa [#allocation3], 1 }

</bundles_post_ra>
